<compile_context>
chip_gen: v6e
topology: v6e:2x2x1
jax: 0.10.0
libtpu: 0.0.40
codegen_flags: <defaults>
</compile_context>

<pallas_src>
import jax
import jax.numpy as jnp
from jax.experimental import pallas as pl
from jax.experimental.pallas import tpu as pltpu

EPS = 1e-5          # PyTorch default eps for InstanceNorm2d / BatchNorm2d
NEG_SLOPE = 0.1     # LeakyReLU(0.1)


# ----------------------------------------------------------------------------
# Fused BasicBlock kernel (built per static shape via closure).
# ----------------------------------------------------------------------------
def _make_basic_block_kernel(N, C, H, W):
    HW = H * W
    R = N * C
    inv_hw = 1.0 / float(HW)

    def kernel(alpha_ref, x_ref, w1_ref, w2_ref, o_ref):
        # alpha_ref : SMEM (2,) f32             [alpha1, alpha2]
        # x_ref     : VMEM (N*C, H*W) f32       input / residual, rows = (n, c)
        # w1_ref/w2_ref: VMEM (N*C, 9*N*C) f32  batch-block-diagonal conv weights
        # o_ref     : VMEM (N*C, H*W) f32       lane-dense output

        # ---- boundary masks over the H*W lane index, hoisted above both convs
        lane = jax.lax.broadcasted_iota(jnp.int32, (1, HW), 1)
        colx = lane % W
        ok_up = lane >= W                  # a source row above exists  (dy = -1)
        ok_dn = lane < (H - 1) * W         # a source row below exists  (dy = +1)
        ok_lf = colx >= 1                  # a source col left exists   (dx = -1)
        ok_rt = colx <= W - 2              # a source col right exists  (dx = +1)

        tap_specs = []                     # (lane shift, validity mask or None)
        for dy in (-1, 0, 1):
            for dx in (-1, 0, 1):
                vm = ok_up if dy == -1 else (ok_dn if dy == 1 else None)
                hm = ok_lf if dx == -1 else (ok_rt if dx == 1 else None)
                if vm is None:
                    m = hm
                elif hm is None:
                    m = vm
                else:
                    m = jnp.logical_and(vm, hm)
                tap_specs.append(((-(dy * W + dx)) % HW, m))

        def conv3x3(y, w_ref):
            """3x3 / stride 1 / pad 1 / no-bias conv for the whole batch as ONE
            matmul.  Taps stay in the lane-dense (N*C, HW) layout (rolls on the
            XLU, zero-pad via vsel); contraction order (k, n, ci) matches the
            wrapper's weight repack, so the (N*Cout, 9*N*Cin) x (9*N*Cin, HW)
            product lands directly in (N*Cout, HW)."""
            taps = []
            for shift, m in tap_specs:
                tp = pltpu.roll(y, shift, axis=1) if shift else y
                if m is not None:
                    tp = jnp.where(m, tp, 0.0)
                taps.append(tp)
            colm = jnp.concatenate(taps, axis=0)                  # (9*N*C, HW)
            return jnp.dot(w_ref[...], colm,
                           preferred_element_type=jnp.float32)    # (N*C, HW)

        def mix_coef(a_scalar):
            # sigmoid(alpha): tiny (1,1) vector so the exp runs on the EUP.
            av = jnp.full((1, 1), a_scalar, dtype=jnp.float32)
            return 1.0 / (1.0 + jnp.exp(-av))

        t1 = mix_coef(alpha_ref[0])
        t2 = mix_coef(alpha_ref[1])

        def an(y, t):
            """t*InstanceNorm(y) + (1-t)*BatchNorm(y), fused into a*y - b."""
            s1 = jnp.sum(y, axis=1, keepdims=True) * inv_hw       # (R,1)  E[x]
            s2 = jnp.sum(y * y, axis=1, keepdims=True) * inv_hw   # (R,1)  E[x^2]
            var_in = s2 - s1 * s1                                  # biased IN var
            # per-channel batch moments (mean over n), broadcast back to rows
            mu_bn = jnp.broadcast_to(
                jnp.mean(s1.reshape(N, C, 1), axis=0, keepdims=True),
                (N, C, 1)).reshape(R, 1)
            ex2_bn = jnp.broadcast_to(
                jnp.mean(s2.reshape(N, C, 1), axis=0, keepdims=True),
                (N, C, 1)).reshape(R, 1)
            var_bn = ex2_bn - mu_bn * mu_bn                        # biased BN var
            inv_in = jax.lax.rsqrt(var_in + EPS)                   # EUP, (R,1)
            inv_bn = jax.lax.rsqrt(var_bn + EPS)
            a = t * inv_in + (1.0 - t) * inv_bn                    # (R,1)
            b = t * s1 * inv_in + (1.0 - t) * mu_bn * inv_bn       # (R,1)
            return a * y - b                                       # 2 VPU passes

        def lrelu(v):
            return jnp.maximum(v, NEG_SLOPE * v)                   # LeakyReLU(0.1)

        x = x_ref[...].astype(jnp.float32)                         # (R, HW)
        out = conv3x3(x, w1_ref)                                   # conv1
        out = lrelu(an(out, t1))                                   # adafbi1 + relu
        out = conv3x3(out, w2_ref)                                 # conv2 (no relayout)
        out = lrelu(an(out, t2) + x)                               # adafbi2 + residual
        # nn.MaxPool2d(stride=1) -> kernel_size 1 -> identity; nothing to do.
        o_ref[...] = out.astype(o_ref.dtype)

    return kernel


# ----------------------------------------------------------------------------
# Wrapper: weight repack + one fused pallas_call; NCHW reshapes stay outside.
# ----------------------------------------------------------------------------
def _repack_weight(w, n_batch):
    """OIHW (Cout,Cin,3,3) -> batch-block-diagonal (N*Cout, 9*N*Cin).

    Column ordering is (k = ky*3+kx, n, ci), matching the kernel's tap concat,
    so a single MXU matmul produces the conv output already in (N*Cout, H*W)."""
    cout, cin = w.shape[0], w.shape[1]
    w_k = jnp.transpose(w, (2, 3, 0, 1)).reshape(9, cout, cin)     # (k, co, ci)
    eye = jnp.eye(n_batch, dtype=jnp.float32)
    w_big = jnp.einsum('koc,nm->nokmc', w_k.astype(jnp.float32), eye)
    return w_big.reshape(n_batch * cout, 9 * n_batch * cin)


@jax.jit
def basic_block_forward(x, w1, w2, alpha1, alpha2):
    """x: (N, C, H, W) f32; w1/w2: (Cout=C, Cin=C, 3, 3) OIHW; alpha*: (1,)."""
    N, C, H, W = x.shape
    Cout = w1.shape[0]
    HW = H * W

    # Layout plumbing / tiny repacks outside the kernel (done once under jit).
    x_flat = x.reshape(N * C, HW).astype(jnp.float32)
    w1m = _repack_weight(w1, N)
    w2m = _repack_weight(w2, N)
    alphas = jnp.concatenate(
        [jnp.ravel(alpha1), jnp.ravel(alpha2)]).astype(jnp.float32)

    kernel = _make_basic_block_kernel(N, C, H, W)
    out_flat = pl.pallas_call(
        kernel,
        out_shape=jax.ShapeDtypeStruct((N * Cout, HW), jnp.float32),
        in_specs=[
            pl.BlockSpec(memory_space=pltpu.MemorySpace.SMEM),   # alphas (2,)
            pl.BlockSpec(memory_space=pltpu.MemorySpace.VMEM),   # x (N*C, HW)
            pl.BlockSpec(memory_space=pltpu.MemorySpace.VMEM),   # w1 (N*C, 9*N*C)
            pl.BlockSpec(memory_space=pltpu.MemorySpace.VMEM),   # w2 (N*C, 9*N*C)
        ],
        out_specs=pl.BlockSpec(memory_space=pltpu.MemorySpace.VMEM),
    )(alphas, x_flat, w1m, w2m)

    # TODO(synk): at production shapes add a grid over N / H-tiles (a "parallel"
    # axis so the v7x second TensorCore is used) with a two-pass cross-tile
    # BatchNorm reduction; a single fused invocation is correct & fastest here.
    return out_flat.reshape(N, Cout, H, W)


# ----------------------------------------------------------------------------
# Pure-JAX reference (matches the PyTorch module) for verification.
# ----------------------------------------------------------------------------
def _ref_forward(x, w1, w2, alpha1, alpha2):
    def conv(xx, w):
        return jax.lax.conv_general_dilated(
            xx, w, window_strides=(1, 1), padding=((1, 1), (1, 1)),
            dimension_numbers=("NCHW", "OIHW", "NCHW"))

    def an(y, alpha):
        t = jax.nn.sigmoid(alpha[0])
        mu_in = y.mean(axis=(2, 3), keepdims=True)
        var_in = ((y - mu_in) ** 2).mean(axis=(2, 3), keepdims=True)
        y_in = (y - mu_in) / jnp.sqrt(var_in + EPS)
        mu_bn = y.mean(axis=(0, 2, 3), keepdims=True)
        var_bn = ((y - mu_bn) ** 2).mean(axis=(0, 2, 3), keepdims=True)
        y_bn = (y - mu_bn) / jnp.sqrt(var_bn + EPS)
        return t * y_in + (1.0 - t) * y_bn

    lrelu = lambda z: jnp.where(z > 0, z, NEG_SLOPE * z)
    out = lrelu(an(conv(x, w1), alpha1))
    out = an(conv(out, w2), alpha2) + x
    return lrelu(out)


if __name__ == "__main__":
    key = jax.random.PRNGKey(0)
    kx, k1, k2 = jax.random.split(key, 3)

    # inplanes == planes == 4 (downsample=None requires matching shapes),
    # stride=1, block_size=1, is_maxpool=True.  NCHW / OIHW like PyTorch.
    N, C, H, W = 2, 4, 16, 16
    x = jax.random.normal(kx, (N, C, H, W), dtype=jnp.float32)
    w1 = 0.1 * jax.random.normal(k1, (C, C, 3, 3), dtype=jnp.float32)   # OIHW
    w2 = 0.1 * jax.random.normal(k2, (C, C, 3, 3), dtype=jnp.float32)   # OIHW
    alpha1 = jnp.zeros((1,), dtype=jnp.float32)   # nn.Parameter([0.0])
    alpha2 = jnp.zeros((1,), dtype=jnp.float32)

    out = basic_block_forward(x, w1, w2, alpha1, alpha2)
    out = jax.block_until_ready(out)

    ref = _ref_forward(x, w1, w2, alpha1, alpha2)
    assert out.shape == (N, C, H, W)
    assert jnp.allclose(out, ref, atol=2e-3, rtol=2e-3), "mismatch vs JAX reference"

    print("KERNEL_OK")
</pallas_src>

<mosaic_0001>
module attributes {stable_mosaic.version = 11 : i64} {
  func.func @kernel(%arg0: memref<2xf32, #tpu.memory_space<smem>>, %arg1: memref<8x256xf32, #tpu.memory_space<vmem>>, %arg2: memref<8x72xf32, #tpu.memory_space<vmem>>, %arg3: memref<8x72xf32, #tpu.memory_space<vmem>>, %arg4: memref<8x256xf32, #tpu.memory_space<vmem>>) attributes {dimension_semantics = [], scalar_prefetch = 0 : i64, scratch_operands = 0 : i64, tpu.core_type = #tpu.core_type<tc>} {
    %0 = tpu.iota {dimensions = array<i32: 1>} : vector<1x256xi32>
    %c16_i32 = arith.constant 16 : i32
    %c0_i32 = arith.constant 0 : i32
    %1 = arith.cmpi eq, %c16_i32, %c0_i32 : i32
    %c1_i32 = arith.constant 1 : i32
    %2 = arith.select %1, %c1_i32, %c16_i32 : i32
    %3 = vector.broadcast %2 : i32 to vector<1x256xi32>
    %4 = arith.remsi %0, %3 : vector<1x256xi32>
    %c0_i32_0 = arith.constant 0 : i32
    %5 = vector.broadcast %c0_i32_0 : i32 to vector<1x256xi32>
    %6 = arith.cmpi ne, %4, %5 : vector<1x256xi32>
    %c0_i32_1 = arith.constant 0 : i32
    %7 = vector.broadcast %c0_i32_1 : i32 to vector<1x256xi32>
    %8 = arith.cmpi slt, %4, %7 : vector<1x256xi32>
    %c0_i32_2 = arith.constant 0 : i32
    %9 = arith.cmpi slt, %2, %c0_i32_2 : i32
    %10 = vector.broadcast %9 : i1 to vector<1x256xi1>
    %11 = vector.broadcast %10 : vector<1x256xi1> to vector<1x256xi1>
    %12 = arith.xori %8, %11 : vector<1x256xi1>
    %13 = arith.andi %12, %6 : vector<1x256xi1>
    %14 = vector.broadcast %2 : i32 to vector<1x256xi32>
    %15 = arith.addi %4, %14 : vector<1x256xi32>
    %16 = arith.select %13, %15, %4 : vector<1x256xi1>, vector<1x256xi32>
    %c16_i32_3 = arith.constant 16 : i32
    %17 = vector.broadcast %c16_i32_3 : i32 to vector<1x256xi32>
    %18 = arith.cmpi sge, %0, %17 : vector<1x256xi32>
    %c240_i32 = arith.constant 240 : i32
    %19 = vector.broadcast %c240_i32 : i32 to vector<1x256xi32>
    %20 = arith.cmpi slt, %0, %19 : vector<1x256xi32>
    %c1_i32_4 = arith.constant 1 : i32
    %21 = vector.broadcast %c1_i32_4 : i32 to vector<1x256xi32>
    %22 = arith.cmpi sge, %16, %21 : vector<1x256xi32>
    %c14_i32 = arith.constant 14 : i32
    %23 = vector.broadcast %c14_i32 : i32 to vector<1x256xi32>
    %24 = arith.cmpi sle, %16, %23 : vector<1x256xi32>
    %25 = arith.andi %18, %22 : vector<1x256xi1>
    %26 = arith.andi %18, %24 : vector<1x256xi1>
    %27 = arith.andi %20, %22 : vector<1x256xi1>
    %28 = arith.andi %20, %24 : vector<1x256xi1>
    %c0 = arith.constant 0 : index
    %29 = memref.load %arg0[%c0] : memref<2xf32, #tpu.memory_space<smem>>
    %30 = vector.broadcast %29 : f32 to vector<1x1xf32>
    %cst = arith.constant 0.000000e+00 : f32
    %31 = vector.broadcast %cst : f32 to vector<1x1xf32>
    %32 = arith.subf %31, %30 : vector<1x1xf32>
    %33 = math.exp %32 : vector<1x1xf32>
    %cst_5 = arith.constant 1.000000e+00 : f32
    %34 = vector.broadcast %cst_5 : f32 to vector<1x1xf32>
    %35 = arith.addf %34, %33 : vector<1x1xf32>
    %cst_6 = arith.constant 1.000000e+00 : f32
    %36 = vector.broadcast %cst_6 : f32 to vector<1x1xf32>
    %37 = arith.divf %36, %35 : vector<1x1xf32>
    %c1 = arith.constant 1 : index
    %38 = memref.load %arg0[%c1] : memref<2xf32, #tpu.memory_space<smem>>
    %39 = vector.broadcast %38 : f32 to vector<1x1xf32>
    %cst_7 = arith.constant 0.000000e+00 : f32
    %40 = vector.broadcast %cst_7 : f32 to vector<1x1xf32>
    %41 = arith.subf %40, %39 : vector<1x1xf32>
    %42 = math.exp %41 : vector<1x1xf32>
    %cst_8 = arith.constant 1.000000e+00 : f32
    %43 = vector.broadcast %cst_8 : f32 to vector<1x1xf32>
    %44 = arith.addf %43, %42 : vector<1x1xf32>
    %cst_9 = arith.constant 1.000000e+00 : f32
    %45 = vector.broadcast %cst_9 : f32 to vector<1x1xf32>
    %46 = arith.divf %45, %44 : vector<1x1xf32>
    %c0_10 = arith.constant 0 : index
    %c0_11 = arith.constant 0 : index
    %47 = vector.load %arg1[%c0_10, %c0_11] : memref<8x256xf32, #tpu.memory_space<vmem>>, vector<8x256xf32>
    %c17_i32 = arith.constant 17 : i32
    %48 = tpu.dynamic_rotate %47 by %c17_i32 dim 1 : vector<8x256xf32>, i32 -> vector<8x256xf32>
    %cst_12 = arith.constant 0.000000e+00 : f32
    %49 = vector.shape_cast %25 : vector<1x256xi1> to vector<1x256xi1>
    %50 = vector.broadcast %49 : vector<1x256xi1> to vector<8x256xi1>
    %51 = vector.broadcast %cst_12 : f32 to vector<8x256xf32>
    %52 = arith.select %50, %48, %51 : vector<8x256xi1>, vector<8x256xf32>
    %c16_i32_13 = arith.constant 16 : i32
    %53 = tpu.dynamic_rotate %47 by %c16_i32_13 dim 1 : vector<8x256xf32>, i32 -> vector<8x256xf32>
    %cst_14 = arith.constant 0.000000e+00 : f32
    %54 = vector.shape_cast %18 : vector<1x256xi1> to vector<1x256xi1>
    %55 = vector.broadcast %54 : vector<1x256xi1> to vector<8x256xi1>
    %56 = vector.broadcast %cst_14 : f32 to vector<8x256xf32>
    %57 = arith.select %55, %53, %56 : vector<8x256xi1>, vector<8x256xf32>
    %c15_i32 = arith.constant 15 : i32
    %58 = tpu.dynamic_rotate %47 by %c15_i32 dim 1 : vector<8x256xf32>, i32 -> vector<8x256xf32>
    %cst_15 = arith.constant 0.000000e+00 : f32
    %59 = vector.shape_cast %26 : vector<1x256xi1> to vector<1x256xi1>
    %60 = vector.broadcast %59 : vector<1x256xi1> to vector<8x256xi1>
    %61 = vector.broadcast %cst_15 : f32 to vector<8x256xf32>
    %62 = arith.select %60, %58, %61 : vector<8x256xi1>, vector<8x256xf32>
    %c1_i32_16 = arith.constant 1 : i32
    %63 = tpu.dynamic_rotate %47 by %c1_i32_16 dim 1 : vector<8x256xf32>, i32 -> vector<8x256xf32>
    %cst_17 = arith.constant 0.000000e+00 : f32
    %64 = vector.shape_cast %22 : vector<1x256xi1> to vector<1x256xi1>
    %65 = vector.broadcast %64 : vector<1x256xi1> to vector<8x256xi1>
    %66 = vector.broadcast %cst_17 : f32 to vector<8x256xf32>
    %67 = arith.select %65, %63, %66 : vector<8x256xi1>, vector<8x256xf32>
    %c255_i32 = arith.constant 255 : i32
    %68 = tpu.dynamic_rotate %47 by %c255_i32 dim 1 : vector<8x256xf32>, i32 -> vector<8x256xf32>
    %cst_18 = arith.constant 0.000000e+00 : f32
    %69 = vector.shape_cast %24 : vector<1x256xi1> to vector<1x256xi1>
    %70 = vector.broadcast %69 : vector<1x256xi1> to vector<8x256xi1>
    %71 = vector.broadcast %cst_18 : f32 to vector<8x256xf32>
    %72 = arith.select %70, %68, %71 : vector<8x256xi1>, vector<8x256xf32>
    %c241_i32 = arith.constant 241 : i32
    %73 = tpu.dynamic_rotate %47 by %c241_i32 dim 1 : vector<8x256xf32>, i32 -> vector<8x256xf32>
    %cst_19 = arith.constant 0.000000e+00 : f32
    %74 = vector.shape_cast %27 : vector<1x256xi1> to vector<1x256xi1>
    %75 = vector.broadcast %74 : vector<1x256xi1> to vector<8x256xi1>
    %76 = vector.broadcast %cst_19 : f32 to vector<8x256xf32>
    %77 = arith.select %75, %73, %76 : vector<8x256xi1>, vector<8x256xf32>
    %c240_i32_20 = arith.constant 240 : i32
    %78 = tpu.dynamic_rotate %47 by %c240_i32_20 dim 1 : vector<8x256xf32>, i32 -> vector<8x256xf32>
    %cst_21 = arith.constant 0.000000e+00 : f32
    %79 = vector.shape_cast %20 : vector<1x256xi1> to vector<1x256xi1>
    %80 = vector.broadcast %79 : vector<1x256xi1> to vector<8x256xi1>
    %81 = vector.broadcast %cst_21 : f32 to vector<8x256xf32>
    %82 = arith.select %80, %78, %81 : vector<8x256xi1>, vector<8x256xf32>
    %c239_i32 = arith.constant 239 : i32
    %83 = tpu.dynamic_rotate %47 by %c239_i32 dim 1 : vector<8x256xf32>, i32 -> vector<8x256xf32>
    %cst_22 = arith.constant 0.000000e+00 : f32
    %84 = vector.shape_cast %28 : vector<1x256xi1> to vector<1x256xi1>
    %85 = vector.broadcast %84 : vector<1x256xi1> to vector<8x256xi1>
    %86 = vector.broadcast %cst_22 : f32 to vector<8x256xf32>
    %87 = arith.select %85, %83, %86 : vector<8x256xi1>, vector<8x256xf32>
    %88 = tpu.concatenate %52, %57, %62, %67, %47, %72, %77, %82, %87 in 0 : vector<8x256xf32>, vector<8x256xf32>, vector<8x256xf32>, vector<8x256xf32>, vector<8x256xf32>, vector<8x256xf32>, vector<8x256xf32>, vector<8x256xf32>, vector<8x256xf32> -> vector<72x256xf32>
    %c0_23 = arith.constant 0 : index
    %c0_24 = arith.constant 0 : index
    %89 = vector.load %arg2[%c0_23, %c0_24] : memref<8x72xf32, #tpu.memory_space<vmem>>, vector<8x72xf32>
    %cst_25 = arith.constant dense<0.000000e+00> : vector<8x256xf32>
    %90 = tpu.matmul %89, %88, %cst_25 {dimension_numbers = #tpu.dot_dimension_numbers<[1], [0], [0], [1], [0, 0, 1, 1], [], []>} : vector<8x72xf32>, vector<72x256xf32>, vector<8x256xf32> -> vector<8x256xf32>
    %cst_26 = arith.constant dense<0.000000e+00> : vector<8xf32>
    %91 = vector.multi_reduction <add>, %90, %cst_26 [1] : vector<8x256xf32> to vector<8xf32>
    %92 = vector.shape_cast %91 : vector<8xf32> to vector<8x1xf32>
    %cst_27 = arith.constant 3.906250e-03 : f32
    %93 = vector.broadcast %cst_27 : f32 to vector<8x1xf32>
    %94 = arith.mulf %92, %93 : vector<8x1xf32>
    %95 = arith.mulf %90, %90 : vector<8x256xf32>
    %cst_28 = arith.constant dense<0.000000e+00> : vector<8xf32>
    %96 = vector.multi_reduction <add>, %95, %cst_28 [1] : vector<8x256xf32> to vector<8xf32>
    %97 = vector.shape_cast %96 : vector<8xf32> to vector<8x1xf32>
    %cst_29 = arith.constant 3.906250e-03 : f32
    %98 = vector.broadcast %cst_29 : f32 to vector<8x1xf32>
    %99 = arith.mulf %97, %98 : vector<8x1xf32>
    %100 = arith.mulf %94, %94 : vector<8x1xf32>
    %101 = arith.subf %99, %100 : vector<8x1xf32>
    %102 = vector.shape_cast %94 : vector<8x1xf32> to vector<2x4x1xf32>
    %cst_30 = arith.constant dense<0.000000e+00> : vector<4x1xf32>
    %103 = vector.multi_reduction <add>, %102, %cst_30 [0] : vector<2x4x1xf32> to vector<4x1xf32>
    %104 = vector.shape_cast %103 : vector<4x1xf32> to vector<1x4x1xf32>
    %cst_31 = arith.constant 2.000000e+00 : f32
    %105 = vector.broadcast %cst_31 : f32 to vector<1x4x1xf32>
    %106 = arith.divf %104, %105 : vector<1x4x1xf32>
    %107 = vector.shape_cast %106 : vector<1x4x1xf32> to vector<1x4x1xf32>
    %108 = vector.broadcast %107 : vector<1x4x1xf32> to vector<2x4x1xf32>
    %109 = vector.shape_cast %108 : vector<2x4x1xf32> to vector<8x1xf32>
    %110 = vector.shape_cast %99 : vector<8x1xf32> to vector<2x4x1xf32>
    %cst_32 = arith.constant dense<0.000000e+00> : vector<4x1xf32>
    %111 = vector.multi_reduction <add>, %110, %cst_32 [0] : vector<2x4x1xf32> to vector<4x1xf32>
    %112 = vector.shape_cast %111 : vector<4x1xf32> to vector<1x4x1xf32>
    %cst_33 = arith.constant 2.000000e+00 : f32
    %113 = vector.broadcast %cst_33 : f32 to vector<1x4x1xf32>
    %114 = arith.divf %112, %113 : vector<1x4x1xf32>
    %115 = vector.shape_cast %114 : vector<1x4x1xf32> to vector<1x4x1xf32>
    %116 = vector.broadcast %115 : vector<1x4x1xf32> to vector<2x4x1xf32>
    %117 = vector.shape_cast %116 : vector<2x4x1xf32> to vector<8x1xf32>
    %118 = arith.mulf %109, %109 : vector<8x1xf32>
    %119 = arith.subf %117, %118 : vector<8x1xf32>
    %cst_34 = arith.constant 9.99999974E-6 : f32
    %120 = vector.broadcast %cst_34 : f32 to vector<8x1xf32>
    %121 = arith.addf %101, %120 : vector<8x1xf32>
    %122 = math.rsqrt %121 : vector<8x1xf32>
    %cst_35 = arith.constant 9.99999974E-6 : f32
    %123 = vector.broadcast %cst_35 : f32 to vector<8x1xf32>
    %124 = arith.addf %119, %123 : vector<8x1xf32>
    %125 = math.rsqrt %124 : vector<8x1xf32>
    %126 = vector.broadcast %37 : vector<1x1xf32> to vector<8x1xf32>
    %127 = arith.mulf %126, %122 : vector<8x1xf32>
    %cst_36 = arith.constant 1.000000e+00 : f32
    %128 = vector.broadcast %cst_36 : f32 to vector<1x1xf32>
    %129 = arith.subf %128, %37 : vector<1x1xf32>
    %130 = vector.broadcast %129 : vector<1x1xf32> to vector<8x1xf32>
    %131 = arith.mulf %130, %125 : vector<8x1xf32>
    %132 = arith.addf %127, %131 : vector<8x1xf32>
    %133 = vector.broadcast %37 : vector<1x1xf32> to vector<8x1xf32>
    %134 = arith.mulf %133, %94 : vector<8x1xf32>
    %135 = arith.mulf %134, %122 : vector<8x1xf32>
    %cst_37 = arith.constant 1.000000e+00 : f32
    %136 = vector.broadcast %cst_37 : f32 to vector<1x1xf32>
    %137 = arith.subf %136, %37 : vector<1x1xf32>
    %138 = vector.broadcast %137 : vector<1x1xf32> to vector<8x1xf32>
    %139 = arith.mulf %138, %109 : vector<8x1xf32>
    %140 = arith.mulf %139, %125 : vector<8x1xf32>
    %141 = arith.addf %135, %140 : vector<8x1xf32>
    %142 = vector.broadcast %132 : vector<8x1xf32> to vector<8x256xf32>
    %143 = arith.mulf %142, %90 : vector<8x256xf32>
    %144 = vector.broadcast %141 : vector<8x1xf32> to vector<8x256xf32>
    %145 = arith.subf %143, %144 : vector<8x256xf32>
    %cst_38 = arith.constant 1.000000e-01 : f32
    %146 = vector.broadcast %cst_38 : f32 to vector<8x256xf32>
    %147 = arith.mulf %146, %145 : vector<8x256xf32>
    %148 = arith.maximumf %145, %147 : vector<8x256xf32>
    %c17_i32_39 = arith.constant 17 : i32
    %149 = tpu.dynamic_rotate %148 by %c17_i32_39 dim 1 : vector<8x256xf32>, i32 -> vector<8x256xf32>
    %cst_40 = arith.constant 0.000000e+00 : f32
    %150 = vector.shape_cast %25 : vector<1x256xi1> to vector<1x256xi1>
    %151 = vector.broadcast %150 : vector<1x256xi1> to vector<8x256xi1>
    %152 = vector.broadcast %cst_40 : f32 to vector<8x256xf32>
    %153 = arith.select %151, %149, %152 : vector<8x256xi1>, vector<8x256xf32>
    %c16_i32_41 = arith.constant 16 : i32
    %154 = tpu.dynamic_rotate %148 by %c16_i32_41 dim 1 : vector<8x256xf32>, i32 -> vector<8x256xf32>
    %cst_42 = arith.constant 0.000000e+00 : f32
    %155 = vector.shape_cast %18 : vector<1x256xi1> to vector<1x256xi1>
    %156 = vector.broadcast %155 : vector<1x256xi1> to vector<8x256xi1>
    %157 = vector.broadcast %cst_42 : f32 to vector<8x256xf32>
    %158 = arith.select %156, %154, %157 : vector<8x256xi1>, vector<8x256xf32>
    %c15_i32_43 = arith.constant 15 : i32
    %159 = tpu.dynamic_rotate %148 by %c15_i32_43 dim 1 : vector<8x256xf32>, i32 -> vector<8x256xf32>
    %cst_44 = arith.constant 0.000000e+00 : f32
    %160 = vector.shape_cast %26 : vector<1x256xi1> to vector<1x256xi1>
    %161 = vector.broadcast %160 : vector<1x256xi1> to vector<8x256xi1>
    %162 = vector.broadcast %cst_44 : f32 to vector<8x256xf32>
    %163 = arith.select %161, %159, %162 : vector<8x256xi1>, vector<8x256xf32>
    %c1_i32_45 = arith.constant 1 : i32
    %164 = tpu.dynamic_rotate %148 by %c1_i32_45 dim 1 : vector<8x256xf32>, i32 -> vector<8x256xf32>
    %cst_46 = arith.constant 0.000000e+00 : f32
    %165 = vector.shape_cast %22 : vector<1x256xi1> to vector<1x256xi1>
    %166 = vector.broadcast %165 : vector<1x256xi1> to vector<8x256xi1>
    %167 = vector.broadcast %cst_46 : f32 to vector<8x256xf32>
    %168 = arith.select %166, %164, %167 : vector<8x256xi1>, vector<8x256xf32>
    %c255_i32_47 = arith.constant 255 : i32
    %169 = tpu.dynamic_rotate %148 by %c255_i32_47 dim 1 : vector<8x256xf32>, i32 -> vector<8x256xf32>
    %cst_48 = arith.constant 0.000000e+00 : f32
    %170 = vector.shape_cast %24 : vector<1x256xi1> to vector<1x256xi1>
    %171 = vector.broadcast %170 : vector<1x256xi1> to vector<8x256xi1>
    %172 = vector.broadcast %cst_48 : f32 to vector<8x256xf32>
    %173 = arith.select %171, %169, %172 : vector<8x256xi1>, vector<8x256xf32>
    %c241_i32_49 = arith.constant 241 : i32
    %174 = tpu.dynamic_rotate %148 by %c241_i32_49 dim 1 : vector<8x256xf32>, i32 -> vector<8x256xf32>
    %cst_50 = arith.constant 0.000000e+00 : f32
    %175 = vector.shape_cast %27 : vector<1x256xi1> to vector<1x256xi1>
    %176 = vector.broadcast %175 : vector<1x256xi1> to vector<8x256xi1>
    %177 = vector.broadcast %cst_50 : f32 to vector<8x256xf32>
    %178 = arith.select %176, %174, %177 : vector<8x256xi1>, vector<8x256xf32>
    %c240_i32_51 = arith.constant 240 : i32
    %179 = tpu.dynamic_rotate %148 by %c240_i32_51 dim 1 : vector<8x256xf32>, i32 -> vector<8x256xf32>
    %cst_52 = arith.constant 0.000000e+00 : f32
    %180 = vector.shape_cast %20 : vector<1x256xi1> to vector<1x256xi1>
    %181 = vector.broadcast %180 : vector<1x256xi1> to vector<8x256xi1>
    %182 = vector.broadcast %cst_52 : f32 to vector<8x256xf32>
    %183 = arith.select %181, %179, %182 : vector<8x256xi1>, vector<8x256xf32>
    %c239_i32_53 = arith.constant 239 : i32
    %184 = tpu.dynamic_rotate %148 by %c239_i32_53 dim 1 : vector<8x256xf32>, i32 -> vector<8x256xf32>
    %cst_54 = arith.constant 0.000000e+00 : f32
    %185 = vector.shape_cast %28 : vector<1x256xi1> to vector<1x256xi1>
    %186 = vector.broadcast %185 : vector<1x256xi1> to vector<8x256xi1>
    %187 = vector.broadcast %cst_54 : f32 to vector<8x256xf32>
    %188 = arith.select %186, %184, %187 : vector<8x256xi1>, vector<8x256xf32>
    %189 = tpu.concatenate %153, %158, %163, %168, %148, %173, %178, %183, %188 in 0 : vector<8x256xf32>, vector<8x256xf32>, vector<8x256xf32>, vector<8x256xf32>, vector<8x256xf32>, vector<8x256xf32>, vector<8x256xf32>, vector<8x256xf32>, vector<8x256xf32> -> vector<72x256xf32>
    %c0_55 = arith.constant 0 : index
    %c0_56 = arith.constant 0 : index
    %190 = vector.load %arg3[%c0_55, %c0_56] : memref<8x72xf32, #tpu.memory_space<vmem>>, vector<8x72xf32>
    %cst_57 = arith.constant dense<0.000000e+00> : vector<8x256xf32>
    %191 = tpu.matmul %190, %189, %cst_57 {dimension_numbers = #tpu.dot_dimension_numbers<[1], [0], [0], [1], [0, 0, 1, 1], [], []>} : vector<8x72xf32>, vector<72x256xf32>, vector<8x256xf32> -> vector<8x256xf32>
    %cst_58 = arith.constant dense<0.000000e+00> : vector<8xf32>
    %192 = vector.multi_reduction <add>, %191, %cst_58 [1] : vector<8x256xf32> to vector<8xf32>
    %193 = vector.shape_cast %192 : vector<8xf32> to vector<8x1xf32>
    %cst_59 = arith.constant 3.906250e-03 : f32
    %194 = vector.broadcast %cst_59 : f32 to vector<8x1xf32>
    %195 = arith.mulf %193, %194 : vector<8x1xf32>
    %196 = arith.mulf %191, %191 : vector<8x256xf32>
    %cst_60 = arith.constant dense<0.000000e+00> : vector<8xf32>
    %197 = vector.multi_reduction <add>, %196, %cst_60 [1] : vector<8x256xf32> to vector<8xf32>
    %198 = vector.shape_cast %197 : vector<8xf32> to vector<8x1xf32>
    %cst_61 = arith.constant 3.906250e-03 : f32
    %199 = vector.broadcast %cst_61 : f32 to vector<8x1xf32>
    %200 = arith.mulf %198, %199 : vector<8x1xf32>
    %201 = arith.mulf %195, %195 : vector<8x1xf32>
    %202 = arith.subf %200, %201 : vector<8x1xf32>
    %203 = vector.shape_cast %195 : vector<8x1xf32> to vector<2x4x1xf32>
    %cst_62 = arith.constant dense<0.000000e+00> : vector<4x1xf32>
    %204 = vector.multi_reduction <add>, %203, %cst_62 [0] : vector<2x4x1xf32> to vector<4x1xf32>
    %205 = vector.shape_cast %204 : vector<4x1xf32> to vector<1x4x1xf32>
    %cst_63 = arith.constant 2.000000e+00 : f32
    %206 = vector.broadcast %cst_63 : f32 to vector<1x4x1xf32>
    %207 = arith.divf %205, %206 : vector<1x4x1xf32>
    %208 = vector.shape_cast %207 : vector<1x4x1xf32> to vector<1x4x1xf32>
    %209 = vector.broadcast %208 : vector<1x4x1xf32> to vector<2x4x1xf32>
    %210 = vector.shape_cast %209 : vector<2x4x1xf32> to vector<8x1xf32>
    %211 = vector.shape_cast %200 : vector<8x1xf32> to vector<2x4x1xf32>
    %cst_64 = arith.constant dense<0.000000e+00> : vector<4x1xf32>
    %212 = vector.multi_reduction <add>, %211, %cst_64 [0] : vector<2x4x1xf32> to vector<4x1xf32>
    %213 = vector.shape_cast %212 : vector<4x1xf32> to vector<1x4x1xf32>
    %cst_65 = arith.constant 2.000000e+00 : f32
    %214 = vector.broadcast %cst_65 : f32 to vector<1x4x1xf32>
    %215 = arith.divf %213, %214 : vector<1x4x1xf32>
    %216 = vector.shape_cast %215 : vector<1x4x1xf32> to vector<1x4x1xf32>
    %217 = vector.broadcast %216 : vector<1x4x1xf32> to vector<2x4x1xf32>
    %218 = vector.shape_cast %217 : vector<2x4x1xf32> to vector<8x1xf32>
    %219 = arith.mulf %210, %210 : vector<8x1xf32>
    %220 = arith.subf %218, %219 : vector<8x1xf32>
    %cst_66 = arith.constant 9.99999974E-6 : f32
    %221 = vector.broadcast %cst_66 : f32 to vector<8x1xf32>
    %222 = arith.addf %202, %221 : vector<8x1xf32>
    %223 = math.rsqrt %222 : vector<8x1xf32>
    %cst_67 = arith.constant 9.99999974E-6 : f32
    %224 = vector.broadcast %cst_67 : f32 to vector<8x1xf32>
    %225 = arith.addf %220, %224 : vector<8x1xf32>
    %226 = math.rsqrt %225 : vector<8x1xf32>
    %227 = vector.broadcast %46 : vector<1x1xf32> to vector<8x1xf32>
    %228 = arith.mulf %227, %223 : vector<8x1xf32>
    %cst_68 = arith.constant 1.000000e+00 : f32
    %229 = vector.broadcast %cst_68 : f32 to vector<1x1xf32>
    %230 = arith.subf %229, %46 : vector<1x1xf32>
    %231 = vector.broadcast %230 : vector<1x1xf32> to vector<8x1xf32>
    %232 = arith.mulf %231, %226 : vector<8x1xf32>
    %233 = arith.addf %228, %232 : vector<8x1xf32>
    %234 = vector.broadcast %46 : vector<1x1xf32> to vector<8x1xf32>
    %235 = arith.mulf %234, %195 : vector<8x1xf32>
    %236 = arith.mulf %235, %223 : vector<8x1xf32>
    %cst_69 = arith.constant 1.000000e+00 : f32
    %237 = vector.broadcast %cst_69 : f32 to vector<1x1xf32>
    %238 = arith.subf %237, %46 : vector<1x1xf32>
    %239 = vector.broadcast %238 : vector<1x1xf32> to vector<8x1xf32>
    %240 = arith.mulf %239, %210 : vector<8x1xf32>
    %241 = arith.mulf %240, %226 : vector<8x1xf32>
    %242 = arith.addf %236, %241 : vector<8x1xf32>
    %243 = vector.broadcast %233 : vector<8x1xf32> to vector<8x256xf32>
    %244 = arith.mulf %243, %191 : vector<8x256xf32>
    %245 = vector.broadcast %242 : vector<8x1xf32> to vector<8x256xf32>
    %246 = arith.subf %244, %245 : vector<8x256xf32>
    %247 = arith.addf %246, %47 : vector<8x256xf32>
    %cst_70 = arith.constant 1.000000e-01 : f32
    %248 = vector.broadcast %cst_70 : f32 to vector<8x256xf32>
    %249 = arith.mulf %248, %247 : vector<8x256xf32>
    %250 = arith.maximumf %247, %249 : vector<8x256xf32>
    %c0_71 = arith.constant 0 : index
    %c0_72 = arith.constant 0 : index
    %251 = vector.load %arg4[%c0_71, %c0_72] : memref<8x256xf32, #tpu.memory_space<vmem>>, vector<8x256xf32>
    tpu.vector_store %arg4[%c0_71, %c0_72], %250 {strides = array<i32>} : memref<8x256xf32, #tpu.memory_space<vmem>>, vector<8x256xf32>,
    return
  }
}

</mosaic_0001>

<bundles_post_ra>
// kernel: basic_block_forward.1
= control target key start
LH: loop header
LB: loop body
LE: loop exit
PB: predicated region body
PF: predicated region fallthrough
CT: control target
= control target key end

     0   :  { %9 = vsyncpa [#allocation3], 0  ;;  %s1019_s0 = inlined_call_operand.vmem [shape: f32[2], index: 0, kind: input, shape index: {}]   ;;  %s1020_s1 = inlined_call_operand.vmem [shape: f32[8,256], index: 1, kind: input, shape index: {}]   ;;  %s1021_s2 = inlined_call_operand.vmem [shape: f32[8,72], index: 2, kind: input, shape index: {}]   ;;  %s1022_s3 = inlined_call_operand.vmem [shape: f32[8,72], index: 3, kind: input, shape index: {}]   ;;  %s1023_s4 = inlined_call_operand.vmem [shape: f32[8,256], index: 4, kind: output, shape index: {}]  }
   0x1   :  { %s16_s17 = sshll.u32 %s1019_s0, 4  ;;  %s17_s17 = int_to_ptr.vmem [resolvable:$true] %s16_s17 }
   0x2   :  { %s669_s18 = scalar_lea.vmem %s17_s17, 16  ;;  %p674_p1 = scmp.lt.s32.totalorder %s17_s17, %s17_s17 }
   0x3   :  { %p670_p0 = scmp.ne.s32.totalorder %s17_s17, %s669_s18  ;;  %p675_p2 = scmp.lt.s32.totalorder %s669_s18, %s669_s18 }
   0x5   :  { %p676_p3 = por %p675_p2, %p674_p1 }
   0x7   :  { %p677_p4 = pnand %p676_p3, %p670_p0 }
   0x9   :  { %680 = shalt.err (!%p677_p4)
}
   0xa   :  { %s683_s19 = smov [#allocation2]  }
   0xb   :  { %19 = dma.vmem_to_smem %s17_s17, 16, %s683_s19, [#allocation3]  }
   0xc   :  { %681 = dma.done.wait [#allocation3], 16  }
   0xd   :  { %682 = vsyncadd [#allocation3], 4294967280 }
   0xe   :  { %29 = sfence }
   0xf   :  { %v727_v0 = vld [vmem:[%s1020_s1] sm:$0xff]  ;;  %s684_s22 = smov 112   ;;  %s685_s0 = smov 111   ;;  %v736_v1 = vld [vmem:[%s1020_s1 + $0x8] sm:$0xff]  ;;  %v689_v2 = vmov 0.0   ;;  %v30_v3 = vlaneseq  ;;  %v693_v55 = vmov 0  }
  0x10   :  { %169 = vrot.lane.b32.xlu1 %v727_v0, %s684_s22  ;;  %182 = vrot.lane.b32.xlu0 %v727_v0, %s685_s0  ;;  %s686_s25 = smov 113   ;;  %s687_s26 = smov 127   ;;  %v195_v48 = vld [vmem:[%s1021_s2] sm:$0xff]  ;;  %v694_v59 = vmov 839922192  }
  0x11   :  { %s688_s1 = smov 1   ;;  %264 = vmatprep.mubr.f32.mxu0 %v689_v2  ;;  %498 = vmatprep.mubr.f32.mxu1 %v689_v2  ;;  %s690_s27 = smov 15   ;;  %v767_v4 = vand.u32 127, %v30_v3  ;;  %v285_v60 = vunpack.c.l.s4 %v694_v59  ;;  %v695_v61 = vmov 1985246804   ;;  %v288_v2 = vshrl.u32 %v30_v3, 7 }
  0x12   :  { %s691_s28 = smov 16   ;;  %s692_s29 = smov 17   ;;  %652 = vset.pattern.permute.xlu1 %v693_v55  ;;  %651 = vset.pattern.permute.xlu0 %v693_v55  ;;  %v292_v62 = vunpack.c.l.s4 %v695_v61 }
  0x13   :  { %v770_v5 = vadd.s32 128, %v767_v4  ;;  %v37_v10 = vand.u32 15, %v767_v4  ;;  %vm186_vm2 = vcmp.lt.s32.totalorder %v767_v4, 111  ;;  %vm173_vm4 = vcmp.lt.s32.totalorder %v767_v4, 112  ;;  %s73_s2 = sld [smem:[#allocation2]] }
  0x14   :  { %171 = vrot.lane.b32.xlu1 %v736_v1, %s684_s22  ;;  %184 = vrot.lane.b32.xlu0 %v736_v1, %s685_s0  ;;  %vm160_vm7 = vcmp.lt.s32.totalorder %v767_v4, 113  ;;  %vm147_vm10 = vcmp.lt.s32.totalorder %v767_v4, 127  ;;  %vm1024_vm11 = vcmp.lt.s32.totalorder %v767_v4, 1  ;;  %vm57_vm12 = vcmp.ge.s32.totalorder %v767_v4, 16  ;;  %s607_s8 = sld [smem:[#allocation2 + $0x1]] }
  0x15   :  { %v44_v6 = vand.u32 15, %v770_v5  ;;  %vm60_vm0 = vcmp.lt.s32.totalorder %v770_v5, 240  ;;  %vm789_vm5 = vcmp.le.s32.totalorder %v37_v10, 14  ;;  %vm820_vm9 = vcmp.ge.s32.totalorder %v37_v10, 1 }
  0x16   :  { %vm1025_vm13 = vcmp.lt.s32.totalorder %v767_v4, 15  ;;  %vm858_vm14 = vmand %vm57_vm12, %vm789_vm5  ;;  %vm1026_vm15 = vcmp.lt.s32.totalorder %v767_v4, 16  ;;  %v286_v63 = vunpack.c.0.s8 %v285_v60 }
  0x17   :  { %vm774_vm1 = vcmp.le.s32.totalorder %v44_v6, 14  ;;  %vm793_vm6 = vcmp.ge.s32.totalorder %v44_v6, 1  ;;  %v293_v6 = vunpack.c.0.s8 %v292_v62 }
  0x18   :  { %158 = vrot.lane.b32.xlu1 %v736_v1, %s686_s25  ;;  %156 = vrot.lane.b32.xlu0 %v727_v0, %s686_s25  ;;  %vm784_vm3 = vmand %vm60_vm0, %vm774_vm1 }
  0x19   :  { %vm812_vm8 = vmand %vm60_vm0, %vm793_vm6  ;;  %v74_v56 = vstv %s73_s2 }
  0x1a   :  { %v75_v57 = vsub.f32 0.0, %v74_v56 }
  0x1c   :  { %145 = vrot.lane.b32.xlu1 %v736_v1, %s687_s26  ;;  %143 = vrot.lane.b32.xlu0 %v727_v0, %s687_s26  ;;  %v76_v58 = vmul.f32 1.442695, %v75_v57 }
  0x1e   :  { %653 = vpow2.f32 %v76_v58 }
  0x20   :  { %132 = vrot.lane.b32.xlu1 %v736_v1, %s688_s1  ;;  %130 = vrot.lane.b32.xlu0 %v727_v0, %s688_s1 }
  0x24   :  { %119 = vrot.lane.b32.xlu1 %v736_v1, %s690_s27  ;;  %117 = vrot.lane.b32.xlu0 %v727_v0, %s690_s27 }
  0x28   :  { %106 = vrot.lane.b32.xlu1 %v736_v1, %s691_s28  ;;  %104 = vrot.lane.b32.xlu0 %v727_v0, %s691_s28 }
  0x2c   :  { %93 = vrot.lane.b32.xlu1 %v736_v1, %s692_s29  ;;  %91 = vrot.lane.b32.xlu0 %v727_v0, %s692_s29 }
  0x82   :  { %v170_v7 = vpop.permute.xlu1 %169  ;;  %v183_v8 = vpop.permute.xlu0 %182 }
  0x86   :  { %v172_v12 = vpop.permute.xlu1 %171  ;;  %v185_v13 = vpop.permute.xlu0 %184 }
  0x87   :  { %v188_v16 = vsel %vm186_vm2, %v185_v13, %v183_v8  ;;  %v187_v17 = vsel %vm186_vm2, %v183_v8, %v185_v13  ;;  %v175_v18 = vsel %vm173_vm4, %v172_v12, %v170_v7  ;;  %v174_v22 = vsel %vm173_vm4, %v170_v7, %v172_v12 }
  0x88   :  { %608 = vmatprep.subr.msk.mxu0 %vm784_vm3, %v188_v16  ;;  %v909_v7 = vsub.s32 %v286_v63, %v288_v2  ;;  %v911_v8 = vsub.s32 %v293_v6, %v288_v2 }
  0x89   :  { %609 = vmatpush1.msk.msra.mxu0 %vm789_vm5, %v187_v17 }
  0x8a   :  { %v159_v20 = vpop.permute.xlu1 %158  ;;  %v157_v21 = vpop.permute.xlu0 %156  ;;  %610 = vmatprep.subr.msk.mxu0 %vm60_vm0, %v175_v18 }
  0x8b   :  { %v161_v24 = vsel %vm160_vm7, %v157_v21, %v159_v20  ;;  %v162_v25 = vsel %vm160_vm7, %v159_v20, %v157_v21  ;;  %217 = vmatpush1.msra.mxu0 %v174_v22  ;;  %v654_v20 = vpop.eup %653 }
  0x8c   :  { %611 = vmatprep.subr.msk.mxu0 %vm812_vm8, %v162_v25 }
  0x8d   :  { %612 = vmatpush1.msk.msra.mxu0 %vm820_vm9, %v161_v24 }
  0x8e   :  { %v146_v26 = vpop.permute.xlu1 %145  ;;  %v144_v27 = vpop.permute.xlu0 %143 }
  0x8f   :  { %v148_v28 = vsel %vm147_vm10, %v144_v27, %v146_v26  ;;  %v149_v29 = vsel %vm147_vm10, %v146_v26, %v144_v27 }
  0x90   :  { %613 = vmatprep.subr.msk.mxu0 %vm774_vm1, %v149_v29 }
  0x91   :  { %614 = vmatpush1.msk.msra.mxu0 %vm789_vm5, %v148_v28  ;;  %v78_v28 = vadd.f32 1.0, %v654_v20 }
  0x92   :  { %v133_v30 = vpop.permute.xlu1 %132  ;;  %v131_v31 = vpop.permute.xlu0 %130  ;;  %222 = vmatprep.subr.mxu0 %v736_v1 }
  0x93   :  { %v135_v32 = vsel %vm1024_vm11, %v131_v31, %v133_v30  ;;  %v136_v33 = vsel %vm1024_vm11, %v133_v30, %v131_v31  ;;  %223 = vmatpush1.msra.mxu0 %v727_v0  ;;  %vm95_vm11 = vcmp.lt.s32.totalorder %v767_v4, 17  ;;  %655 = vrcp.f32 %v78_v28 }
  0x94   :  { %615 = vmatprep.subr.msk.mxu0 %vm793_vm6, %v135_v32 }
  0x95   :  { %616 = vmatpush1.msk.msra.mxu0 %vm820_vm9, %v136_v33 }
  0x96   :  { %v120_v34 = vpop.permute.xlu1 %119  ;;  %v118_v35 = vpop.permute.xlu0 %117 }
  0x97   :  { %v122_v37 = vsel %vm1025_vm13, %v118_v35, %v120_v34  ;;  %v123_v38 = vsel %vm1025_vm13, %v120_v34, %v118_v35  ;;  %vm882_vm13 = vmand %vm57_vm12, %vm820_vm9 }
  0x98   :  { %617 = vmatprep.subr.msk.mxu0 %vm774_vm1, %v122_v37 }
  0x99   :  { %618 = vmatpush1.msk.msra.mxu0 %vm858_vm14, %v123_v38 }
  0x9a   :  { %v107_v39 = vpop.permute.xlu1 %106  ;;  %v105_v40 = vpop.permute.xlu0 %104 }
  0x9b   :  { %v110_v41 = vsel %vm1026_vm15, %v107_v39, %v105_v40  ;;  %v109_v42 = vsel %vm1026_vm15, %v105_v40, %v107_v39  ;;  %vm1027_vm15 = vcmask 588800  }
  0x9c   :  { %228 = vmatprep.subr.mxu0 %v109_v42 }
  0x9d   :  { %619 = vmatpush1.msk.msra.mxu0 %vm57_vm12, %v110_v41 }
  0x9e   :  { %v94_v43 = vpop.permute.xlu1 %93  ;;  %v92_v44 = vpop.permute.xlu0 %91 }
  0x9f   :  { %v96_v46 = vsel %vm95_vm11, %v92_v44, %v94_v43  ;;  %v97_v47 = vsel %vm95_vm11, %v94_v43, %v92_v44 }
  0xa0   :  { %620 = vmatprep.subr.msk.mxu0 %vm793_vm6, %v96_v46  ;;  %v656_v39 = vpop.eup %655 }
  0xa1   :  { %621 = vmatpush1.msk.msra.mxu0 %vm882_vm13, %v97_v47  ;;  %v334_v40 = vsub.f32 1.0, %v656_v39 }
  0xa2   :  { %622 = vmatmul.mubr.msk.f32.vlgmr.msra.gmra.mxu0 %vm1027_vm15, %v195_v48  ;;  %vm300_vm15 = vcmask 1043456  }
 0x162   :  { %v898_v49 = vpop.f32.mrf.mxu0 }
 0x163   :  { %v275_v53 = vmul.f32 %v898_v49, %v898_v49 }
 0x164   :  { %v900_v50 = vpop.f32.mrf.mxu0 }
 0x165   :  { %v276_v51 = vmul.f32 %v900_v50, %v900_v50  ;;  %v271_v52 = vadd.f32 %v900_v50, %v898_v49 }
 0x167   :  { %272 = vadd.xlane.f32.xlu0 %v271_v52  ;;  %v277_v54 = vadd.f32 %v276_v51, %v275_v53 }
 0x169   :  { %278 = vadd.xlane.f32.xlu1 %v277_v54 }
 0x1f0   :  { %v273_v10 = vpop.xlane.xlu0 %272 }
 0x1f1   :  { %v274_v12 = vmul.f32 0.00390625, %v273_v10 }
 0x1f2   :  { %v279_v13 = vpop.xlane.xlu1 %278 }
 0x1f3   :  { %v290_v16 = vrot.slane %v274_v12, %v909_v7  ;;  %v297_v17 = vrot.slane %v274_v12, %v911_v8  ;;  %v280_v18 = vmul.f32 0.00390625, %v279_v13  ;;  %v281_v21 = vmul.f32 %v274_v12, %v274_v12 }
 0x1f4   :  { %v340_v44 = vmul.f32 %v656_v39, %v274_v12 }
 0x1f5   :  { %v301_v22 = vsel %vm300_vm15, %v290_v16, 0.0  ;;  %v302_v3 = vsel %vm300_vm15, %v297_v17, 0.0  ;;  %v313_v24 = vrot.slane %v280_v18, %v909_v7  ;;  %v320_v26 = vrot.slane %v280_v18, %v911_v8 }
 0x1f6   :  { %v303_v25 = vadd.f32 %v302_v3, %v301_v22  ;;  %v282_v30 = vsub.f32 %v280_v18, %v281_v21 }
 0x1f7   :  { %v323_v27 = vsel %vm300_vm15, %v313_v24, 0.0  ;;  %v324_v31 = vsel %vm300_vm15, %v320_v26, 0.0 }
 0x1f8   :  { %v305_v29 = vmul.f32 0.5, %v303_v25  ;;  %v325_v32 = vadd.f32 %v324_v31, %v323_v27  ;;  %v329_v35 = vadd.f32 1e-05, %v282_v30 }
 0x1fa   :  { %v327_v33 = vmul.f32 %v305_v29, %v305_v29  ;;  %v326_v34 = vmul.f32 0.5, %v325_v32  ;;  %657 = vrsqrt.f32 %v329_v35  ;;  %v342_v42 = vmul.f32 %v334_v40, %v305_v29 }
 0x1fc   :  { %v328_v37 = vsub.f32 %v326_v34, %v327_v33 }
 0x1fe   :  { %v331_v38 = vadd.f32 1e-05, %v328_v37 }
 0x200   :  { %659 = vrsqrt.f32 %v331_v38  ;;  %v430_v38 = vld [vmem:[%s1022_s3] sm:$0xff] }
 0x207   :  { %v658_v41 = vpop.eup %657 }
 0x208   :  { %v341_v48 = vmul.f32 %v658_v41, %v340_v44  ;;  %v333_v52 = vmul.f32 %v658_v41, %v656_v39  ;;  %v82_v44 = vstv %s607_s8 }
 0x20d   :  { %v660_v43 = vpop.eup %659 }
 0x20e   :  { %v343_v46 = vmul.f32 %v660_v43, %v342_v42  ;;  %v335_v47 = vmul.f32 %v660_v43, %v334_v40 }
 0x210   :  { %v345_v51 = vcombine.low %v343_v46, %v343_v46  ;;  %v337_v53 = vcombine.low %v335_v47, %v335_v47  ;;  %v83_v46 = vsub.f32 0.0, %v82_v44 }
 0x212   :  { %v347_v54 = vadd.f32 %v345_v51, %v341_v48  ;;  %v339_v55 = vadd.f32 %v337_v53, %v333_v52  ;;  %v84_v47 = vmul.f32 1.442695, %v83_v46 }
 0x214   :  { %357 = vperm.xlu1 %652, %v347_v54   ;;  %350 = vperm.xlu0 %651, %v339_v55   ;;  %661 = vpow2.f32 %v84_v47 }
 0x221   :  { %v662_v54 = vpop.eup %661 }
 0x28f   :  { %v351_v56 = vpop.permute.xlu0 %350  ;;  %v358_v59 = vpop.permute.xlu1 %357 }
 0x290   :  { %v353_v57 = vmul.f32 %v351_v56, %v898_v49  ;;  %v354_v58 = vmul.f32 %v351_v56, %v900_v50 }
 0x292   :  { %v360_v60 = vsub.f32 %v353_v57, %v358_v59  ;;  %v361_v61 = vsub.f32 %v354_v58, %v358_v59 }
 0x294   :  { %v362_v62 = vmul.f32 0.1, %v360_v60  ;;  %v363_v63 = vmul.f32 0.1, %v361_v61 }
 0x296   :  { %v364_v2 = vmax.f32 %v360_v60, %v362_v62  ;;  %v365_v6 = vmax.f32 %v361_v61, %v363_v63  ;;  %v86_v62 = vadd.f32 1.0, %v662_v54 }
 0x298   :  { %398 = vrot.lane.b32.xlu0 %v364_v2, %s687_s26  ;;  %422 = vrot.lane.b32.xlu1 %v364_v2, %s685_s0  ;;  %663 = vrcp.f32 %v86_v62 }
 0x29c   :  { %390 = vrot.lane.b32.xlu0 %v364_v2, %s688_s1  ;;  %424 = vrot.lane.b32.xlu1 %v365_v6, %s685_s0 }
 0x2a0   :  { %382 = vrot.lane.b32.xlu0 %v364_v2, %s690_s27  ;;  %414 = vrot.lane.b32.xlu1 %v364_v2, %s684_s22 }
 0x2a4   :  { %374 = vrot.lane.b32.xlu0 %v364_v2, %s691_s28  ;;  %416 = vrot.lane.b32.xlu1 %v365_v6, %s684_s22 }
 0x2a8   :  { %366 = vrot.lane.b32.xlu0 %v364_v2, %s692_s29  ;;  %406 = vrot.lane.b32.xlu1 %v364_v2, %s686_s25 }
 0x2ac   :  { %408 = vrot.lane.b32.xlu1 %v365_v6, %s686_s25 }
 0x2b0   :  { %400 = vrot.lane.b32.xlu1 %v365_v6, %s687_s26 }
 0x2b4   :  { %392 = vrot.lane.b32.xlu1 %v365_v6, %s688_s1 }
 0x2b8   :  { %384 = vrot.lane.b32.xlu1 %v365_v6, %s690_s27 }
 0x2bc   :  { %376 = vrot.lane.b32.xlu1 %v365_v6, %s691_s28 }
 0x2c0   :  { %368 = vrot.lane.b32.xlu1 %v365_v6, %s692_s29 }
 0x30a   :  { %v423_v49 = vpop.permute.xlu1 %422  ;;  %v399_v20 = vpop.permute.xlu0 %398 }
 0x30e   :  { %v425_v50 = vpop.permute.xlu1 %424  ;;  %v391_v24 = vpop.permute.xlu0 %390 }
 0x30f   :  { %v427_v10 = vsel %vm186_vm2, %v425_v50, %v423_v49  ;;  %v426_v12 = vsel %vm186_vm2, %v423_v49, %v425_v50 }
 0x310   :  { %623 = vmatprep.subr.msk.mxu1 %vm784_vm3, %v427_v10  ;;  %vm1046_vm3 = vcmp.lt.s32.totalorder %v767_v4, 15 }
 0x311   :  { %624 = vmatpush1.msk.msra.mxu1 %vm789_vm5, %v426_v12 }
 0x312   :  { %v415_v13 = vpop.permute.xlu1 %414  ;;  %v383_v27 = vpop.permute.xlu0 %382 }
 0x316   :  { %v417_v16 = vpop.permute.xlu1 %416  ;;  %v375_v32 = vpop.permute.xlu0 %374 }
 0x317   :  { %v419_v17 = vsel %vm173_vm4, %v417_v16, %v415_v13  ;;  %v418_v18 = vsel %vm173_vm4, %v415_v13, %v417_v16  ;;  %vm1047_vm4 = vmmov %vm1046_vm3 }
 0x318   :  { %625 = vmatprep.subr.msk.mxu1 %vm60_vm0, %v419_v17  ;;  %vm1044_vm0 = vcmp.lt.s32.totalorder %v767_v4, 1 }
 0x319   :  { %451 = vmatpush1.msra.mxu1 %v418_v18  ;;  %vm1045_vm2 = vmmov %vm1044_vm0 }
 0x31a   :  { %v407_v21 = vpop.permute.xlu1 %406  ;;  %v367_v35 = vpop.permute.xlu0 %366 }
 0x31e   :  { %v409_v22 = vpop.permute.xlu1 %408 }
 0x31f   :  { %v410_v11 = vsel %vm160_vm7, %v407_v21, %v409_v22  ;;  %v411_v3 = vsel %vm160_vm7, %v409_v22, %v407_v21 }
 0x320   :  { %626 = vmatprep.subr.msk.mxu1 %vm812_vm8, %v411_v3 }
 0x321   :  { %627 = vmatpush1.msk.msra.mxu1 %vm820_vm9, %v410_v11 }
 0x322   :  { %v401_v25 = vpop.permute.xlu1 %400 }
 0x323   :  { %v402_v5 = vsel %vm147_vm10, %v399_v20, %v401_v25  ;;  %v403_v26 = vsel %vm147_vm10, %v401_v25, %v399_v20 }
 0x324   :  { %628 = vmatprep.subr.msk.mxu1 %vm774_vm1, %v403_v26 }
 0x325   :  { %629 = vmatpush1.msk.msra.mxu1 %vm789_vm5, %v402_v5  ;;  %vm1048_vm5 = vcmp.lt.s32.totalorder %v767_v4, 16 }
 0x326   :  { %456 = vmatprep.subr.mxu1 %v365_v6  ;;  %v393_v19 = vpop.permute.xlu1 %392  ;;  %vm1049_vm7 = vmmov %vm1048_vm5 }
 0x327   :  { %v394_v28 = vsel %vm1044_vm0, %v391_v24, %v393_v19  ;;  %v395_v29 = vsel %vm1045_vm2, %v393_v19, %v391_v24  ;;  %457 = vmatpush1.msra.mxu1 %v364_v2 }
 0x328   :  { %630 = vmatprep.subr.msk.mxu1 %vm793_vm6, %v394_v28 }
 0x329   :  { %631 = vmatpush1.msk.msra.mxu1 %vm820_vm9, %v395_v29 }
 0x32a   :  { %v385_v30 = vpop.permute.xlu1 %384 }
 0x32b   :  { %v386_v14 = vsel %vm1046_vm3, %v383_v27, %v385_v30  ;;  %v387_v31 = vsel %vm1047_vm4, %v385_v30, %v383_v27 }
 0x32c   :  { %632 = vmatprep.subr.msk.mxu1 %vm774_vm1, %v386_v14  ;;  %vm1050_vm1 = vcmask 588800  }
 0x32d   :  { %633 = vmatpush1.msk.msra.mxu1 %vm858_vm14, %v387_v31 }
 0x32e   :  { %v377_v33 = vpop.permute.xlu1 %376 }
 0x32f   :  { %v379_v34 = vsel %vm1048_vm5, %v377_v33, %v375_v32  ;;  %v378_v23 = vsel %vm1049_vm7, %v375_v32, %v377_v33 }
 0x330   :  { %462 = vmatprep.subr.mxu1 %v378_v23 }
 0x331   :  { %634 = vmatpush1.msk.msra.mxu1 %vm57_vm12, %v379_v34 }
 0x332   :  { %v369_v37 = vpop.permute.xlu1 %368 }
 0x333   :  { %v370_v9 = vsel %vm95_vm11, %v367_v35, %v369_v37  ;;  %v371_v36 = vsel %vm95_vm11, %v369_v37, %v367_v35 }
 0x334   :  { %635 = vmatprep.subr.msk.mxu1 %vm793_vm6, %v370_v9 }
 0x335   :  { %636 = vmatpush1.msk.msra.mxu1 %vm882_vm13, %v371_v36 }
 0x336   :  { %637 = vmatmul.mubr.msk.f32.vlgmr.msra.gmra.mxu1 %vm1050_vm1, %v430_v38 }
 0x3f6   :  { %v500_v39 = vpop.f32.mrf.mxu1 }
 0x3f7   :  { %v509_v43 = vmul.f32 %v500_v39, %v500_v39 }
 0x3f8   :  { %v502_v40 = vpop.f32.mrf.mxu1 }
 0x3f9   :  { %v510_v41 = vmul.f32 %v502_v40, %v502_v40  ;;  %v505_v42 = vadd.f32 %v502_v40, %v500_v39 }
 0x3fb   :  { %506 = vadd.xlane.f32.xlu0 %v505_v42  ;;  %v511_v4 = vadd.f32 %v510_v41, %v509_v43 }
 0x3fd   :  { %512 = vadd.xlane.f32.xlu1 %v511_v4 }
 0x484   :  { %v507_v15 = vpop.xlane.xlu0 %506 }
 0x485   :  { %v508_v48 = vmul.f32 0.00390625, %v507_v15 }
 0x486   :  { %v513_v51 = vpop.xlane.xlu1 %512 }
 0x487   :  { %v524_v45 = vrot.slane %v508_v48, %v909_v7  ;;  %v531_v52 = vrot.slane %v508_v48, %v911_v8  ;;  %v514_v53 = vmul.f32 0.00390625, %v513_v51  ;;  %v515_v55 = vmul.f32 %v508_v48, %v508_v48 }
 0x489   :  { %v534_v56 = vsel %vm300_vm15, %v524_v45, 0.0  ;;  %v535_v57 = vsel %vm300_vm15, %v531_v52, 0.0  ;;  %v545_v58 = vrot.slane %v514_v53, %v909_v7  ;;  %v552_v60 = vrot.slane %v514_v53, %v911_v8  ;;  %v664_v7 = vpop.eup %663 }
 0x48a   :  { %v536_v59 = vadd.f32 %v535_v57, %v534_v56  ;;  %v516_v2 = vsub.f32 %v514_v53, %v515_v55  ;;  %v566_v17 = vsub.f32 1.0, %v664_v7  ;;  %v572_v21 = vmul.f32 %v664_v7, %v508_v48 }
 0x48b   :  { %v555_v61 = vsel %vm300_vm15, %v545_v58, 0.0  ;;  %v556_v6 = vsel %vm300_vm15, %v552_v60, 0.0 }
 0x48c   :  { %v537_v63 = vmul.f32 0.5, %v536_v59  ;;  %v557_v49 = vadd.f32 %v556_v6, %v555_v61  ;;  %v561_v12 = vadd.f32 1e-05, %v516_v2 }
 0x48e   :  { %v559_v50 = vmul.f32 %v537_v63, %v537_v63  ;;  %v558_v10 = vmul.f32 0.5, %v557_v49  ;;  %665 = vrsqrt.f32 %v561_v12  ;;  %v574_v8 = vmul.f32 %v566_v17, %v537_v63 }
 0x490   :  { %v560_v13 = vsub.f32 %v558_v10, %v559_v50 }
 0x492   :  { %v563_v16 = vadd.f32 1e-05, %v560_v13 }
 0x494   :  { %667 = vrsqrt.f32 %v563_v16 }
 0x49b   :  { %v666_v18 = vpop.eup %665 }
 0x49c   :  { %v573_v3 = vmul.f32 %v666_v18, %v572_v21  ;;  %v565_v25 = vmul.f32 %v666_v18, %v664_v7 }
 0x4a1   :  { %v668_v20 = vpop.eup %667 }
 0x4a2   :  { %v575_v22 = vmul.f32 %v668_v20, %v574_v8  ;;  %v567_v11 = vmul.f32 %v668_v20, %v566_v17 }
 0x4a4   :  { %v577_v24 = vcombine.low %v575_v22, %v575_v22  ;;  %v569_v5 = vcombine.low %v567_v11, %v567_v11 }
 0x4a6   :  { %v579_v26 = vadd.f32 %v577_v24, %v573_v3  ;;  %v571_v27 = vadd.f32 %v569_v5, %v565_v25 }
 0x4a8   :  { %589 = vperm.xlu1 %652, %v579_v26   ;;  %582 = vperm.xlu0 %651, %v571_v27  }
 0x523   :  { %v583_v19 = vpop.permute.xlu0 %582  ;;  %v590_v30 = vpop.permute.xlu1 %589 }
 0x524   :  { %v585_v28 = vmul.f32 %v583_v19, %v500_v39  ;;  %v586_v29 = vmul.f32 %v583_v19, %v502_v40 }
 0x526   :  { %v592_v14 = vsub.f32 %v585_v28, %v590_v30  ;;  %v593_v31 = vsub.f32 %v586_v29, %v590_v30 }
 0x528   :  { %v594_v32 = vadd.f32 %v592_v14, %v727_v0  ;;  %v595_v33 = vadd.f32 %v593_v31, %v736_v1 }
 0x52a   :  { %v596_v34 = vmul.f32 0.1, %v594_v32  ;;  %v597_v23 = vmul.f32 0.1, %v595_v33 }
 0x52c   :  { %v598_v35 = vmax.f32 %v594_v32, %v596_v34  ;;  %v599_v37 = vmax.f32 %v595_v33, %v597_v23 }
 0x52e   :  { %600 = vst [vmem:[%s1023_s4] sm:$0xff] %v598_v35  ;;  %601 = vst [vmem:[%s1023_s4 + $0x8] sm:$0xff] %v599_v37 }
 0x52f   :  { %606 = vsyncpa [#allocation3], 1 }

</bundles_post_ra>
